<compile_context>
chip_gen: v5e
topology: v5e:2x2
jax: 0.10.0
libtpu: 0.0.40
codegen_flags: <defaults>
</compile_context>

<pallas_src>
import jax
import jax.numpy as jnp
from jax.experimental import pallas as pl
from jax.experimental.pallas import tpu as pltpu


_LANE = 128                      # vreg lane width / channel padding granularity
_TMAX = 1024                     # max row / contraction tile
_VMEM_LIMIT = 32 * 1024 * 1024   # fits all gens (v7x scoped default is 32 MiB)


def _round_up(x, m):
    return ((x + m - 1) // m) * m


def _cdiv(a, b):
    return -(-a // b)


def _pick_tiles(n):
    """Adaptive tile size: big tiles, minimal quadratic zero-padding."""
    n128 = _round_up(n, _LANE)
    num_tiles = _cdiv(n128, _TMAX)
    t = _round_up(_cdiv(n128, num_tiles), _LANE)
    return t, num_tiles * t


# ---------------------------------------------------------------------------
# Fused per-layer kernel: Z = PReLU(A @ (X @ W) + b)
# ---------------------------------------------------------------------------
def _fused_layer_kernel(a_ref, x_ref, w_ref, b_ref, alpha_ref, o_ref, acc_ref):
    k = pl.program_id(1)

    @pl.when(k == 0)
    def _():
        acc_ref[...] = jnp.zeros_like(acc_ref)

    # h_tile = X_ktile @ W  (bf16 MXU, f32 result). Recomputed per row tile;
    # the kernel is HBM-bound on the A stream so this rides in MXU slack.
    h = jnp.dot(x_ref[...], w_ref[...], preferred_element_type=jnp.float32)
    acc_ref[...] += jnp.dot(
        a_ref[...], h.astype(jnp.bfloat16), preferred_element_type=jnp.float32
    )

    @pl.when(k == pl.num_programs(1) - 1)
    def _():
        z = acc_ref[...] + b_ref[...]
        o_ref[...] = jnp.where(z > 0.0, z, alpha_ref[...] * z).astype(o_ref.dtype)


def _fused_gcn_layer(a, x, w, b2, alpha2, *, tm, tk):
    n_pad = a.shape[0]
    d_in = x.shape[1]
    d_out = w.shape[1]
    return pl.pallas_call(
        _fused_layer_kernel,
        out_shape=jax.ShapeDtypeStruct((n_pad, d_out), jnp.bfloat16),
        grid_spec=pltpu.PrefetchScalarGridSpec(
            num_scalar_prefetch=0,
            grid=(n_pad // tm, n_pad // tk),
            in_specs=[
                pl.BlockSpec((tm, tk), lambda i, k: (i, k)),        # A row/K tile (bf16)
                pl.BlockSpec((tk, d_in), lambda i, k: (k, 0)),      # X K tile    (bf16)
                pl.BlockSpec((d_in, d_out), lambda i, k: (0, 0)),   # W (fetched once)
                pl.BlockSpec((1, d_out), lambda i, k: (0, 0)),      # bias (once)
                pl.BlockSpec((1, d_out), lambda i, k: (0, 0)),      # alpha (once)
            ],
            out_specs=pl.BlockSpec((tm, d_out), lambda i, k: (i, 0)),
            scratch_shapes=[pltpu.VMEM((tm, d_out), jnp.float32)],
        ),
        compiler_params=pltpu.CompilerParams(
            dimension_semantics=("parallel", "arbitrary"),
            vmem_limit_bytes=_VMEM_LIMIT,
        ),
    )(a, x, w, b2, alpha2)


# ---------------------------------------------------------------------------
# Dense symmetric-normalized adjacency (torch_geometric gcn_norm semantics,
# incl. add_remaining_self_loops: existing self-loops scatter-add their
# weights, nodes without one get fill_value = 1).
# ---------------------------------------------------------------------------
def normalized_adjacency(edge_index, edge_weight, num_nodes):
    src = edge_index[0]
    dst = edge_index[1]
    if edge_weight is None:
        edge_weight = jnp.ones(src.shape, jnp.float32)
    edge_weight = edge_weight.astype(jnp.float32)

    a = jnp.zeros((num_nodes, num_nodes), jnp.float32).at[dst, src].add(edge_weight)

    has_loop = (
        jnp.zeros((num_nodes,), jnp.bool_)
        .at[jnp.where(src == dst, src, num_nodes)]
        .set(True, mode="drop")
    )
    a = a + jnp.diag(jnp.where(has_loop, 0.0, 1.0))

    deg = a.sum(axis=1)
    dis = jnp.where(deg > 0, jax.lax.rsqrt(deg), 0.0)
    return dis[:, None] * a * dis[None, :]


# ---------------------------------------------------------------------------
# GConv forward: num_layers x (GCNConv + shared per-channel PReLU)
# ---------------------------------------------------------------------------
def gconv_forward(x, edge_index, edge_weight, params):
    n, d_in = x.shape
    hidden = params["prelu_alpha"].shape[0]
    d_out_pad = _round_up(hidden, _LANE)
    t, n_pad = _pick_tiles(n)

    # Dense normalized adjacency: f32 math, zero-pad, stream as bf16.
    a_norm = normalized_adjacency(edge_index, edge_weight, n)
    a_pad = (
        jnp.zeros((n_pad, n_pad), jnp.bfloat16)
        .at[:n, :n]
        .set(a_norm.astype(jnp.bfloat16))
    )

    alpha2 = (
        jnp.zeros((1, d_out_pad), jnp.float32)
        .at[0, :hidden]
        .set(params["prelu_alpha"].astype(jnp.float32))
    )

    # bf16, lane-dense activations kept end-to-end; slice/cast once at the end.
    d_in_pad = _round_up(d_in, _LANE)
    z = (
        jnp.zeros((n_pad, d_in_pad), jnp.bfloat16)
        .at[:n, :d_in]
        .set(x.astype(jnp.bfloat16))
    )

    for w, b in zip(params["weights"], params["biases"]):
        din_l, dout_l = w.shape
        w_pad = (
            jnp.zeros((z.shape[1], d_out_pad), jnp.bfloat16)
            .at[:din_l, :dout_l]
            .set(w.astype(jnp.bfloat16))
        )
        b2 = (
            jnp.zeros((1, d_out_pad), jnp.float32)
            .at[0, :dout_l]
            .set(b.astype(jnp.float32))
        )
        z = _fused_gcn_layer(a_pad, z, w_pad, b2, alpha2, tm=t, tk=t)

    return z[:n, :hidden].astype(jnp.float32)


def init_params(key, input_dim, hidden_dim, num_layers):
    weights, biases = [], []
    for i in range(num_layers):
        d_in = input_dim if i == 0 else hidden_dim
        key, wk, bk = jax.random.split(key, 3)
        scale = jnp.sqrt(6.0 / (d_in + hidden_dim))
        w = jax.random.uniform(wk, (d_in, hidden_dim), jnp.float32, -scale, scale)
        b = jax.random.uniform(bk, (hidden_dim,), jnp.float32, -0.1, 0.1)
        weights.append(w)
        biases.append(b)
    # nn.PReLU(hidden_dim) default init: 0.25 per channel
    alpha = jnp.full((hidden_dim,), 0.25, jnp.float32)
    return {"weights": weights, "biases": biases, "prelu_alpha": alpha}


# Pure-JAX f32 reference for correctness checking.
def gconv_reference(x, edge_index, edge_weight, params):
    a_norm = normalized_adjacency(edge_index, edge_weight, x.shape[0])
    z = x
    alpha = params["prelu_alpha"][None, :]
    for w, b in zip(params["weights"], params["biases"]):
        z = a_norm @ (z @ w) + b[None, :]
        z = jnp.where(z > 0, z, alpha * z)
    return z


if __name__ == "__main__":
    key = jax.random.PRNGKey(0)

    num_nodes = 16
    input_dim = 8
    hidden_dim = 32
    num_layers = 2
    num_edges = 40

    k_x, k_src, k_dst, k_w, k_p = jax.random.split(key, 5)
    x = jax.random.normal(k_x, (num_nodes, input_dim), jnp.float32)
    src = jax.random.randint(k_src, (num_edges,), 0, num_nodes)
    dst = jax.random.randint(k_dst, (num_edges,), 0, num_nodes)
    edge_index = jnp.stack([src, dst], axis=0)
    edge_weight = jax.random.uniform(k_w, (num_edges,), jnp.float32, 0.5, 1.5)

    params = init_params(k_p, input_dim, hidden_dim, num_layers)

    fwd = jax.jit(gconv_forward)
    out = fwd(x, edge_index, edge_weight, params)
    out = jax.block_until_ready(out)

    ref = gconv_reference(x, edge_index, edge_weight, params)
    assert out.shape == (num_nodes, hidden_dim)
    # A / activations / W streamed in bf16 (f32 MXU accumulation) -> relaxed
    # tolerance vs the f32 reference.
    assert jnp.allclose(out, ref, atol=5e-2, rtol=5e-2), "mismatch vs reference"

    print("KERNEL_OK")
</pallas_src>

<mosaic_0001>
module attributes {stable_mosaic.version = 11 : i64} {
  func.func @_fused_layer_kernel(%arg0: i32, %arg1: i32, %arg2: memref<128x128xbf16, #tpu.memory_space<vmem>>, %arg3: memref<128x128xbf16, #tpu.memory_space<vmem>>, %arg4: memref<128x128xbf16, #tpu.memory_space<vmem>>, %arg5: memref<1x128xf32, #tpu.memory_space<vmem>>, %arg6: memref<1x128xf32, #tpu.memory_space<vmem>>, %arg7: memref<128x128xbf16, #tpu.memory_space<vmem>>, %arg8: memref<128x128xf32, #tpu.memory_space<vmem>>) attributes {dimension_semantics = [#tpu.dimension_semantics<parallel>, #tpu.dimension_semantics<arbitrary>], iteration_bounds = array<i64: 1, 1>, scalar_prefetch = 0 : i64, scratch_operands = 1 : i64, tpu.core_type = #tpu.core_type<tc>, window_params = [{transform_indices = @transform_0, window_bounds = array<i64: 128, 128>}, {transform_indices = @transform_1, window_bounds = array<i64: 128, 128>}, {pipeline_mode = #tpu.pipeline_mode<synchronous>, transform_indices = @transform_2, window_bounds = array<i64: 128, 128>}, {pipeline_mode = #tpu.pipeline_mode<synchronous>, transform_indices = @transform_3, window_bounds = array<i64: 1, 128>}, {pipeline_mode = #tpu.pipeline_mode<synchronous>, transform_indices = @transform_4, window_bounds = array<i64: 1, 128>}, {transform_indices = @transform_5, window_bounds = array<i64: 128, 128>}]} {
    %c0_i32 = arith.constant 0 : i32
    %0 = arith.cmpi eq, %arg1, %c0_i32 : i32
    %1 = arith.extui %0 : i1 to i32
    %c0_i32_0 = arith.constant 0 : i32
    %2 = arith.cmpi ne, %1, %c0_i32_0 : i32
    scf.if %2 {
      %cst_13 = arith.constant 0.000000e+00 : f32
      %15 = vector.broadcast %cst_13 : f32 to vector<128x128xf32>
      %c0_14 = arith.constant 0 : index
      %c0_15 = arith.constant 0 : index
      %16 = vector.load %arg8[%c0_14, %c0_15] : memref<128x128xf32, #tpu.memory_space<vmem>>, vector<128x128xf32>
      tpu.vector_store %arg8[%c0_14, %c0_15], %15 {strides = array<i32>} : memref<128x128xf32, #tpu.memory_space<vmem>>, vector<128x128xf32>,
    } else {
    }
    %c0 = arith.constant 0 : index
    %c0_1 = arith.constant 0 : index
    %3 = vector.load %arg3[%c0, %c0_1] : memref<128x128xbf16, #tpu.memory_space<vmem>>, vector<128x128xbf16>
    %c0_2 = arith.constant 0 : index
    %c0_3 = arith.constant 0 : index
    %4 = vector.load %arg4[%c0_2, %c0_3] : memref<128x128xbf16, #tpu.memory_space<vmem>>, vector<128x128xbf16>
    %cst = arith.constant dense<0.000000e+00> : vector<128x128xf32>
    %5 = tpu.matmul %3, %4, %cst {dimension_numbers = #tpu.dot_dimension_numbers<[1], [0], [0], [1], [0, 0, 1, 1], [], []>} : vector<128x128xbf16>, vector<128x128xbf16>, vector<128x128xf32> -> vector<128x128xf32>
    %c0_4 = arith.constant 0 : index
    %c0_5 = arith.constant 0 : index
    %6 = vector.load %arg8[%c0_4, %c0_5] : memref<128x128xf32, #tpu.memory_space<vmem>>, vector<128x128xf32>
    %c0_6 = arith.constant 0 : index
    %c0_7 = arith.constant 0 : index
    %7 = vector.load %arg2[%c0_6, %c0_7] : memref<128x128xbf16, #tpu.memory_space<vmem>>, vector<128x128xbf16>
    %8 = arith.truncf %5 : vector<128x128xf32> to vector<128x128xbf16>
    %cst_8 = arith.constant dense<0.000000e+00> : vector<128x128xf32>
    %9 = tpu.matmul %7, %8, %cst_8 {dimension_numbers = #tpu.dot_dimension_numbers<[1], [0], [0], [1], [0, 0, 1, 1], [], []>} : vector<128x128xbf16>, vector<128x128xbf16>, vector<128x128xf32> -> vector<128x128xf32>
    %10 = arith.addf %6, %9 : vector<128x128xf32>
    %c0_9 = arith.constant 0 : index
    %c0_10 = arith.constant 0 : index
    %11 = vector.load %arg8[%c0_9, %c0_10] : memref<128x128xf32, #tpu.memory_space<vmem>>, vector<128x128xf32>
    tpu.vector_store %arg8[%c0_9, %c0_10], %10 {strides = array<i32>} : memref<128x128xf32, #tpu.memory_space<vmem>>, vector<128x128xf32>,
    %c0_i32_11 = arith.constant 0 : i32
    %12 = arith.cmpi eq, %arg1, %c0_i32_11 : i32
    %13 = arith.extui %12 : i1 to i32
    %c0_i32_12 = arith.constant 0 : i32
    %14 = arith.cmpi ne, %13, %c0_i32_12 : i32
    scf.if %14 {
      %c0_13 = arith.constant 0 : index
      %c0_14 = arith.constant 0 : index
      %15 = vector.load %arg8[%c0_13, %c0_14] : memref<128x128xf32, #tpu.memory_space<vmem>>, vector<128x128xf32>
      %c0_15 = arith.constant 0 : index
      %c0_16 = arith.constant 0 : index
      %16 = vector.load %arg5[%c0_15, %c0_16] : memref<1x128xf32, #tpu.memory_space<vmem>>, vector<1x128xf32>
      %17 = vector.broadcast %16 : vector<1x128xf32> to vector<128x128xf32>
      %18 = arith.addf %15, %17 : vector<128x128xf32>
      %cst_17 = arith.constant 0.000000e+00 : f32
      %19 = vector.broadcast %cst_17 : f32 to vector<128x128xf32>
      %20 = arith.cmpf ogt, %18, %19 : vector<128x128xf32>
      %c0_18 = arith.constant 0 : index
      %c0_19 = arith.constant 0 : index
      %21 = vector.load %arg6[%c0_18, %c0_19] : memref<1x128xf32, #tpu.memory_space<vmem>>, vector<1x128xf32>
      %22 = vector.broadcast %21 : vector<1x128xf32> to vector<128x128xf32>
      %23 = arith.mulf %22, %18 : vector<128x128xf32>
      %24 = arith.select %20, %18, %23 : vector<128x128xi1>, vector<128x128xf32>
      %25 = arith.truncf %24 : vector<128x128xf32> to vector<128x128xbf16>
      %c0_20 = arith.constant 0 : index
      %c0_21 = arith.constant 0 : index
      %26 = vector.load %arg7[%c0_20, %c0_21] : memref<128x128xbf16, #tpu.memory_space<vmem>>, vector<128x128xbf16>
      tpu.vector_store %arg7[%c0_20, %c0_21], %25 {strides = array<i32>} : memref<128x128xbf16, #tpu.memory_space<vmem>>, vector<128x128xbf16>,
    } else {
    }
    return
  }
  func.func @transform_0(%arg0: i32, %arg1: i32) -> (i32, i32) {
    %c0_i32 = arith.constant 0 : i32
    return %arg0, %arg1 : i32, i32
  }
  func.func @transform_1(%arg0: i32, %arg1: i32) -> (i32, i32) {
    %c0_i32 = arith.constant 0 : i32
    %c0_i32_0 = arith.constant 0 : i32
    return %arg1, %c0_i32 : i32, i32
  }
  func.func @transform_2(%arg0: i32, %arg1: i32) -> (i32, i32) {
    %c0_i32 = arith.constant 0 : i32
    %c0_i32_0 = arith.constant 0 : i32
    %c0_i32_1 = arith.constant 0 : i32
    return %c0_i32, %c0_i32_0 : i32, i32
  }
  func.func @transform_3(%arg0: i32, %arg1: i32) -> (i32, i32) {
    %c0_i32 = arith.constant 0 : i32
    %c0_i32_0 = arith.constant 0 : i32
    %c0_i32_1 = arith.constant 0 : i32
    return %c0_i32, %c0_i32_0 : i32, i32
  }
  func.func @transform_4(%arg0: i32, %arg1: i32) -> (i32, i32) {
    %c0_i32 = arith.constant 0 : i32
    %c0_i32_0 = arith.constant 0 : i32
    %c0_i32_1 = arith.constant 0 : i32
    return %c0_i32, %c0_i32_0 : i32, i32
  }
  func.func @transform_5(%arg0: i32, %arg1: i32) -> (i32, i32) {
    %c0_i32 = arith.constant 0 : i32
    %c0_i32_0 = arith.constant 0 : i32
    return %arg0, %c0_i32 : i32, i32
  }
}

</mosaic_0001>

<bundles_post_ra>
// kernel: gconv_forward.2
= control target key start
LH: loop header
LB: loop body
LE: loop exit
PB: predicated region body
PF: predicated region fallthrough
CT: control target
= control target key end

     0   :  { %s866_s2 = inlined_call_operand.vmem [shape: bf16[128,128], index: 2, kind: input, shape index: {}]   ;;  %s867_s1 = inlined_call_operand.vmem [shape: bf16[128,128], index: 1, kind: input, shape index: {}]   ;;  %s868_s3 = inlined_call_operand.vmem [shape: f32[1,128], index: 3, kind: input, shape index: {}]   ;;  %s869_s4 = inlined_call_operand.vmem [shape: f32[1,128], index: 4, kind: input, shape index: {}]   ;;  %s870_s0 = inlined_call_operand.vmem [shape: bf16[128,128], index: 0, kind: input, shape index: {}]   ;;  %s871_s5 = inlined_call_operand.vmem [shape: bf16[128,128], index: 5, kind: output, shape index: {}]  }
   0x1   :  { %v624_v0 = vld [vmem:[%s866_s2 + $0x38] sm:$0xff]  ;;  %v623_v1 = vld [vmem:[%s866_s2 + $0x30] sm:$0xff]  ;;  %v622_v2 = vld [vmem:[%s866_s2 + $0x28] sm:$0xff] }
   0x2   :  { %680 = vmatpush.bf16.msra.mxu2 %v624_v0  ;;  %168 = vmatpush.bf16.msra.mxu0 %v624_v0  ;;  %v621_v3 = vld [vmem:[%s866_s2 + $0x20] sm:$0xff]  ;;  %v620_v4 = vld [vmem:[%s866_s2 + $0x18] sm:$0xff]  ;;  %v619_v5 = vld [vmem:[%s866_s2 + $0x10] sm:$0xff] }
   0x3   :  { %v618_v6 = vld [vmem:[%s866_s2 + $0x8] sm:$0xff]  ;;  %v617_v7 = vld [vmem:[%s866_s2] sm:$0xff]  ;;  %v615_v12 = vld [vmem:[%s867_s1 + $0x30] sm:$0xff] }
   0x4   :  { %v613_v8 = vld [vmem:[%s867_s1 + $0x20] sm:$0xff]  ;;  %v614_v10 = vld [vmem:[%s867_s1 + $0x28] sm:$0xff]  ;;  %v611_v13 = vld [vmem:[%s867_s1 + $0x10] sm:$0xff] }
   0x5   :  { %v609_v9 = vld [vmem:[%s867_s1] sm:$0xff]  ;;  %v610_v11 = vld [vmem:[%s867_s1 + $0x8] sm:$0xff]  ;;  %v616_v14 = vld [vmem:[%s867_s1 + $0x38] sm:$0xff] }
   0x6   :  { %681 = vmatpush.bf16.msra.mxu2 %v623_v1  ;;  %169 = vmatpush.bf16.msra.mxu0 %v623_v1  ;;  %v612_v15 = vld [vmem:[%s867_s1 + $0x18] sm:$0xff]  ;;  %v625_v40 = vld [vmem:[%s870_s0] sm:$0xff]  ;;  %v626_v42 = vld [vmem:[%s870_s0 + $0x8] sm:$0xff] }
   0x7   :  { %v629_v41 = vld [vmem:[%s870_s0 + $0x20] sm:$0xff]  ;;  %v630_v43 = vld [vmem:[%s870_s0 + $0x28] sm:$0xff]  ;;  %v627_v44 = vld [vmem:[%s870_s0 + $0x10] sm:$0xff] }
   0x8   :  { %v631_v45 = vld [vmem:[%s870_s0 + $0x30] sm:$0xff]  ;;  %v628_v46 = vld [vmem:[%s870_s0 + $0x18] sm:$0xff]  ;;  %v803_v49 = vld [vmem:[%s868_s3] ss:$0 sm:$0xff] }
   0x9   :  { %v632_v47 = vld [vmem:[%s870_s0 + $0x38] sm:$0xff]  ;;  %v809_v51 = vld [vmem:[%s869_s4] ss:$0 sm:$0xff] }
   0xa   :  { %682 = vmatpush.bf16.msra.mxu2 %v622_v2  ;;  %170 = vmatpush.bf16.msra.mxu0 %v622_v2 }
   0xe   :  { %683 = vmatpush.bf16.msra.mxu2 %v621_v3  ;;  %171 = vmatpush.bf16.msra.mxu0 %v621_v3 }
  0x12   :  { %684 = vmatpush.bf16.msra.mxu2 %v620_v4  ;;  %172 = vmatpush.bf16.msra.mxu0 %v620_v4 }
  0x16   :  { %685 = vmatpush.bf16.msra.mxu2 %v619_v5  ;;  %173 = vmatpush.bf16.msra.mxu0 %v619_v5 }
  0x1a   :  { %686 = vmatpush.bf16.msra.mxu2 %v618_v6  ;;  %174 = vmatpush.bf16.msra.mxu0 %v618_v6 }
  0x1e   :  { %687 = vmatpush.bf16.msra.mxu2 %v617_v7  ;;  %175 = vmatpush.bf16.msra.mxu0 %v617_v7 }
  0x21   :  { %196 = vmatmul.bf16.vlgmr.msra.gmra.mxu2 %v613_v8  ;;  %176 = vmatmul.bf16.vlgmr.msra.gmra.mxu0 %v609_v9 }
  0x31   :  { %201 = vmatmul.bf16.gmra.mxu2 %v614_v10  ;;  %181 = vmatmul.bf16.gmra.mxu0 %v610_v11 }
  0x41   :  { %206 = vmatmul.bf16.gmra.mxu2 %v615_v12  ;;  %186 = vmatmul.bf16.gmra.mxu0 %v611_v13 }
  0x51   :  { %211 = vmatmul.bf16.gmra.mxu2 %v616_v14  ;;  %191 = vmatmul.bf16.gmra.mxu0 %v612_v15 }
  0x9e   :  { %v177_v17 = vpop.f32.mrf.mxu0 }
  0xa4   :  { %v197_v16 = vpop.f32.mrf.mxu2 }
  0xa6   :  { %v179_v19 = vpop.f32.mrf.mxu0 }
  0xa7   :  { %v249_v39 = vpack.c.bf16 %v179_v19, %v177_v17 }
  0xac   :  { %v199_v18 = vpop.f32.mrf.mxu2 }
  0xad   :  { %v253_v34 = vpack.c.bf16 %v199_v18, %v197_v16 }
  0xae   :  { %v182_v21 = vpop.f32.mrf.mxu0 }
  0xb4   :  { %v202_v20 = vpop.f32.mrf.mxu2 }
  0xb6   :  { %v184_v23 = vpop.f32.mrf.mxu0 }
  0xb7   :  { %v250_v38 = vpack.c.bf16 %v184_v23, %v182_v21 }
  0xbc   :  { %v204_v22 = vpop.f32.mrf.mxu2 }
  0xbd   :  { %v254_v33 = vpack.c.bf16 %v204_v22, %v202_v20 }
  0xbe   :  { %v187_v25 = vpop.f32.mrf.mxu0 }
  0xc4   :  { %v207_v24 = vpop.f32.mrf.mxu2 }
  0xc6   :  { %v189_v28 = vpop.f32.mrf.mxu0 }
  0xc7   :  { %v251_v37 = vpack.c.bf16 %v189_v28, %v187_v25 }
  0xcc   :  { %v209_v26 = vpop.f32.mrf.mxu2 }
  0xcd   :  { %v255_v32 = vpack.c.bf16 %v209_v26, %v207_v24 }
  0xce   :  { %v192_v31 = vpop.f32.mrf.mxu0 }
  0xd4   :  { %v212_v27 = vpop.f32.mrf.mxu2 }
  0xd6   :  { %v194_v35 = vpop.f32.mrf.mxu0 }
  0xd7   :  { %v252_v36 = vpack.c.bf16 %v194_v35, %v192_v31 }
  0xdc   :  { %v214_v29 = vpop.f32.mrf.mxu2 }
  0xdd   :  { %v256_v30 = vpack.c.bf16 %v214_v29, %v212_v27 }
  0xdf   :  { %305 = vmatpush.bf16.msra.mxu1 %v256_v30  ;;  %688 = vmatpush.bf16.msra.mxu3 %v256_v30 }
  0xe3   :  { %306 = vmatpush.bf16.msra.mxu1 %v255_v32  ;;  %689 = vmatpush.bf16.msra.mxu3 %v255_v32 }
  0xe7   :  { %307 = vmatpush.bf16.msra.mxu1 %v254_v33  ;;  %690 = vmatpush.bf16.msra.mxu3 %v254_v33 }
  0xeb   :  { %308 = vmatpush.bf16.msra.mxu1 %v253_v34  ;;  %691 = vmatpush.bf16.msra.mxu3 %v253_v34 }
  0xef   :  { %309 = vmatpush.bf16.msra.mxu1 %v252_v36  ;;  %692 = vmatpush.bf16.msra.mxu3 %v252_v36 }
  0xf3   :  { %310 = vmatpush.bf16.msra.mxu1 %v251_v37  ;;  %693 = vmatpush.bf16.msra.mxu3 %v251_v37 }
  0xf7   :  { %311 = vmatpush.bf16.msra.mxu1 %v250_v38  ;;  %694 = vmatpush.bf16.msra.mxu3 %v250_v38 }
  0xfb   :  { %312 = vmatpush.bf16.msra.mxu1 %v249_v39  ;;  %695 = vmatpush.bf16.msra.mxu3 %v249_v39 }
  0xfe   :  { %313 = vmatmul.bf16.vlgmr.msra.gmra.mxu1 %v625_v40  ;;  %333 = vmatmul.bf16.vlgmr.msra.gmra.mxu3 %v629_v41 }
 0x10e   :  { %318 = vmatmul.bf16.gmra.mxu1 %v626_v42  ;;  %338 = vmatmul.bf16.gmra.mxu3 %v630_v43 }
 0x11e   :  { %323 = vmatmul.bf16.gmra.mxu1 %v627_v44  ;;  %343 = vmatmul.bf16.gmra.mxu3 %v631_v45 }
 0x12e   :  { %328 = vmatmul.bf16.gmra.mxu1 %v628_v46  ;;  %348 = vmatmul.bf16.gmra.mxu3 %v632_v47 }
 0x17b   :  { %v314_v48 = vpop.f32.mrf.mxu1 }
 0x17c   :  { %v409_v50 = vadd.f32 %v803_v49, %v314_v48 }
 0x17e   :  { %v445_v54 = vmul.f32 %v809_v51, %v409_v50  ;;  %vm425_vm0 = vcmp.gt.f32.partialorder %v409_v50, 0.0 }
 0x180   :  { %v461_v58 = vsel %vm425_vm0, %v409_v50, %v445_v54 }
 0x181   :  { %v334_v52 = vpop.f32.mrf.mxu3 }
 0x182   :  { %v417_v56 = vadd.f32 %v803_v49, %v334_v52 }
 0x183   :  { %v316_v53 = vpop.f32.mrf.mxu1 }
 0x184   :  { %v410_v55 = vadd.f32 %v803_v49, %v316_v53  ;;  %v453_v62 = vmul.f32 %v809_v51, %v417_v56  ;;  %vm433_vm2 = vcmp.gt.f32.partialorder %v417_v56, 0.0 }
 0x186   :  { %vm426_vm1 = vcmp.gt.f32.partialorder %v410_v55, 0.0  ;;  %v446_v57 = vmul.f32 %v809_v51, %v410_v55  ;;  %v469_v2 = vsel %vm433_vm2, %v417_v56, %v453_v62 }
 0x188   :  { %v462_v59 = vsel %vm426_vm1, %v410_v55, %v446_v57 }
 0x189   :  { %v636_v60 = vpack.c.bf16 %v462_v59, %v461_v58  ;;  %v336_v61 = vpop.f32.mrf.mxu3 }
 0x18a   :  { %v418_v63 = vadd.f32 %v803_v49, %v336_v61 }
 0x18b   :  { %637 = vst [vmem:[%s871_s5] sm:$0xff] %v636_v60   ;;  %v319_v0 = vpop.f32.mrf.mxu1 }
 0x18c   :  { %vm434_vm3 = vcmp.gt.f32.partialorder %v418_v63, 0.0  ;;  %v454_v1 = vmul.f32 %v809_v51, %v418_v63  ;;  %v411_v5 = vadd.f32 %v803_v49, %v319_v0 }
 0x18e   :  { %v470_v3 = vsel %vm434_vm3, %v418_v63, %v454_v1  ;;  %v447_v8 = vmul.f32 %v809_v51, %v411_v5  ;;  %vm427_vm4 = vcmp.gt.f32.partialorder %v411_v5, 0.0 }
 0x18f   :  { %v656_v4 = vpack.c.bf16 %v470_v3, %v469_v2 }
 0x190   :  { %v463_v12 = vsel %vm427_vm4, %v411_v5, %v447_v8 }
 0x191   :  { %676 = vst [vmem:[%s871_s5 + $0x20] sm:$0xff] %v656_v4   ;;  %v339_v6 = vpop.f32.mrf.mxu3 }
 0x192   :  { %v419_v10 = vadd.f32 %v803_v49, %v339_v6 }
 0x193   :  { %v321_v7 = vpop.f32.mrf.mxu1 }
 0x194   :  { %v412_v9 = vadd.f32 %v803_v49, %v321_v7  ;;  %v455_v16 = vmul.f32 %v809_v51, %v419_v10  ;;  %vm435_vm6 = vcmp.gt.f32.partialorder %v419_v10, 0.0 }
 0x196   :  { %vm428_vm5 = vcmp.gt.f32.partialorder %v412_v9, 0.0  ;;  %v448_v11 = vmul.f32 %v809_v51, %v412_v9  ;;  %v471_v20 = vsel %vm435_vm6, %v419_v10, %v455_v16 }
 0x198   :  { %v464_v13 = vsel %vm428_vm5, %v412_v9, %v448_v11 }
 0x199   :  { %v641_v14 = vpack.c.bf16 %v464_v13, %v463_v12  ;;  %v341_v15 = vpop.f32.mrf.mxu3 }
 0x19a   :  { %v420_v17 = vadd.f32 %v803_v49, %v341_v15 }
 0x19b   :  { %673 = vst [vmem:[%s871_s5 + $0x8] sm:$0xff] %v641_v14   ;;  %v324_v18 = vpop.f32.mrf.mxu1 }
 0x19c   :  { %vm436_vm7 = vcmp.gt.f32.partialorder %v420_v17, 0.0  ;;  %v456_v19 = vmul.f32 %v809_v51, %v420_v17  ;;  %v413_v23 = vadd.f32 %v803_v49, %v324_v18 }
 0x19e   :  { %v472_v21 = vsel %vm436_vm7, %v420_v17, %v456_v19  ;;  %v449_v26 = vmul.f32 %v809_v51, %v413_v23  ;;  %vm429_vm8 = vcmp.gt.f32.partialorder %v413_v23, 0.0 }
 0x19f   :  { %v661_v22 = vpack.c.bf16 %v472_v21, %v471_v20 }
 0x1a0   :  { %v465_v30 = vsel %vm429_vm8, %v413_v23, %v449_v26 }
 0x1a1   :  { %677 = vst [vmem:[%s871_s5 + $0x28] sm:$0xff] %v661_v22   ;;  %v344_v24 = vpop.f32.mrf.mxu3 }
 0x1a2   :  { %v421_v28 = vadd.f32 %v803_v49, %v344_v24 }
 0x1a3   :  { %v326_v25 = vpop.f32.mrf.mxu1 }
 0x1a4   :  { %v414_v27 = vadd.f32 %v803_v49, %v326_v25  ;;  %v457_v34 = vmul.f32 %v809_v51, %v421_v28  ;;  %vm437_vm10 = vcmp.gt.f32.partialorder %v421_v28, 0.0 }
 0x1a6   :  { %vm430_vm9 = vcmp.gt.f32.partialorder %v414_v27, 0.0  ;;  %v450_v29 = vmul.f32 %v809_v51, %v414_v27  ;;  %v473_v38 = vsel %vm437_vm10, %v421_v28, %v457_v34 }
 0x1a8   :  { %v466_v31 = vsel %vm430_vm9, %v414_v27, %v450_v29 }
 0x1a9   :  { %v646_v32 = vpack.c.bf16 %v466_v31, %v465_v30  ;;  %v346_v33 = vpop.f32.mrf.mxu3 }
 0x1aa   :  { %v422_v35 = vadd.f32 %v803_v49, %v346_v33 }
 0x1ab   :  { %674 = vst [vmem:[%s871_s5 + $0x10] sm:$0xff] %v646_v32   ;;  %v329_v36 = vpop.f32.mrf.mxu1 }
 0x1ac   :  { %vm438_vm11 = vcmp.gt.f32.partialorder %v422_v35, 0.0  ;;  %v458_v37 = vmul.f32 %v809_v51, %v422_v35  ;;  %v415_v41 = vadd.f32 %v803_v49, %v329_v36 }
 0x1ae   :  { %v474_v39 = vsel %vm438_vm11, %v422_v35, %v458_v37  ;;  %v451_v44 = vmul.f32 %v809_v51, %v415_v41  ;;  %vm431_vm12 = vcmp.gt.f32.partialorder %v415_v41, 0.0 }
 0x1af   :  { %v666_v40 = vpack.c.bf16 %v474_v39, %v473_v38 }
 0x1b0   :  { %v467_v48 = vsel %vm431_vm12, %v415_v41, %v451_v44 }
 0x1b1   :  { %678 = vst [vmem:[%s871_s5 + $0x30] sm:$0xff] %v666_v40   ;;  %v349_v42 = vpop.f32.mrf.mxu3 }
 0x1b2   :  { %v423_v46 = vadd.f32 %v803_v49, %v349_v42 }
 0x1b3   :  { %v331_v43 = vpop.f32.mrf.mxu1 }
 0x1b4   :  { %v416_v45 = vadd.f32 %v803_v49, %v331_v43  ;;  %v459_v54 = vmul.f32 %v809_v51, %v423_v46  ;;  %vm439_vm14 = vcmp.gt.f32.partialorder %v423_v46, 0.0 }
 0x1b6   :  { %vm432_vm13 = vcmp.gt.f32.partialorder %v416_v45, 0.0  ;;  %v452_v47 = vmul.f32 %v809_v51, %v416_v45  ;;  %v475_v57 = vsel %vm439_vm14, %v423_v46, %v459_v54 }
 0x1b8   :  { %v468_v50 = vsel %vm432_vm13, %v416_v45, %v452_v47 }
 0x1b9   :  { %v651_v52 = vpack.c.bf16 %v468_v50, %v467_v48  ;;  %v351_v53 = vpop.f32.mrf.mxu3 }
 0x1ba   :  { %v424_v55 = vadd.f32 %v803_v49, %v351_v53 }
 0x1bb   :  { %675 = vst [vmem:[%s871_s5 + $0x18] sm:$0xff] %v651_v52  }
 0x1bc   :  { %vm440_vm15 = vcmp.gt.f32.partialorder %v424_v55, 0.0  ;;  %v460_v56 = vmul.f32 %v809_v51, %v424_v55 }
 0x1be   :  { %v476_v58 = vsel %vm440_vm15, %v424_v55, %v460_v56 }
 0x1bf   :  { %v671_v59 = vpack.c.bf16 %v476_v58, %v475_v57 }
 0x1c1   :  { %679 = vst [vmem:[%s871_s5 + $0x38] sm:$0xff] %v671_v59  }

</bundles_post_ra>
